<compile_context>
chip_gen: v7x
topology: tpu7x:2x2x1
jax: 0.10.0
libtpu: 0.0.40
codegen_flags: <defaults>
</compile_context>

<pallas_src>
import jax
import jax.numpy as jnp
from jax import lax
from jax.experimental import pallas as pl
from jax.experimental.pallas import tpu as pltpu


def _global_attention_pool_kernel(
    x_ref,          # [N, D] f32   node features (VMEM)
    src_ref,        # [E, 1] i32   edge sources, column layout (VMEM)
    dst_row_ref,    # [1, E] i32   edge targets, row layout    (VMEM)
    batch_col_ref,  # [N, 1] i32   graph id per node, column layout (VMEM)
    batch_row_ref,  # [1, N] i32   graph id per node, row layout    (VMEM)
    w_rel_ref,      # [D, 1] f32   GraphConv lin_rel weight (VMEM)
    w_root_ref,     # [D, 1] f32   GraphConv lin_root weight (VMEM)
    b_rel_ref,      # [1, 1] f32   GraphConv lin_rel bias (SMEM)
    out_ref,        # [B, D] f32   pooled graph embeddings (VMEM)
):
    x = x_ref[...]                                  # [N, D]
    N, D = x.shape
    E = src_ref.shape[0]
    B = out_ref.shape[0]
    f32 = jnp.float32

    # --- project to scalar scores BEFORE aggregating -----------------------
    # (agg @ W_rel == scatter_add(s_rel[src], dst) because W_rel is linear)
    s_rel = jnp.dot(x, w_rel_ref[...], preferred_element_type=f32)    # [N, 1]
    s_root = jnp.dot(x, w_root_ref[...], preferred_element_type=f32)  # [N, 1]

    # --- edge scatter-add of the scalar s_rel (thin one-hot matmuls) -------
    # gather:  gathered[e] = s_rel[src[e]]
    src_oh = (src_ref[...] ==
              lax.broadcasted_iota(jnp.int32, (E, N), 1)).astype(f32)  # [E, N]
    gathered = jnp.dot(src_oh, s_rel, preferred_element_type=f32)      # [E, 1]
    # scatter: score_agg[i] = sum_{e: dst[e]==i} gathered[e]
    # (one-hot built directly as [N, E] so the contraction is on natural axes)
    dst_oh = (lax.broadcasted_iota(jnp.int32, (N, E), 0) ==
              dst_row_ref[...]).astype(f32)                            # [N, E]
    score_agg = jnp.dot(dst_oh, gathered, preferred_element_type=f32)  # [N, 1]

    # GraphConv(64, 1): score = agg @ W_rel + x @ W_root + b
    score = score_agg + s_root + b_rel_ref[0, 0]                       # [N, 1]

    # --- per-graph (segment) softmax via [N,B] membership (no [N,N] temps) --
    memb_nb = (batch_col_ref[...] ==
               lax.broadcasted_iota(jnp.int32, (N, B), 1))             # [N, B] bool
    memb_nb_f = memb_nb.astype(f32)                                    # [N, B]

    neg_big = jnp.float32(-1e30)
    masked = jnp.where(memb_nb, score, neg_big)                        # [N, B]
    gmax_b = jnp.max(masked, axis=0, keepdims=True)                    # [1, B] per-graph max
    gmax_n = jnp.sum(memb_nb_f * gmax_b, axis=1, keepdims=True)        # [N, 1] gmax[batch[i]]
    e_n = jnp.exp(score - gmax_n)                                      # [N, 1] (only N exps)
    denom_b = jnp.sum(memb_nb_f * e_n, axis=0, keepdims=True)          # [1, B] per-graph sum
    denom_n = jnp.sum(memb_nb_f * denom_b, axis=1, keepdims=True)      # [N, 1] denom[batch[i]]
    soft = e_n * pl.reciprocal(denom_n, approx=True)                   # [N, 1]

    # --- att_x = x * score ; global_add_pool (bf16 MXU, f32 accumulation) ---
    att_x = x * soft                                                   # [N, D]
    memb_bn = (lax.broadcasted_iota(jnp.int32, (B, N), 0) ==
               batch_row_ref[...]).astype(jnp.bfloat16)                # [B, N] exact 0/1
    out_ref[...] = jnp.dot(memb_bn, att_x.astype(jnp.bfloat16),
                           preferred_element_type=f32)                 # [B, D]


def global_attention_pool(x, edge_index, batch, w_rel, b_rel, w_root, num_graphs):
    """x: [N, D] f32, edge_index: [2, E] i32, batch: [N] i32 -> [num_graphs, D]."""
    N, D = x.shape
    E = edge_index.shape[1]
    src_col = edge_index[0].reshape(E, 1).astype(jnp.int32)
    dst_row = edge_index[1].reshape(1, E).astype(jnp.int32)
    batch_col = batch.reshape(N, 1).astype(jnp.int32)
    batch_row = batch.reshape(1, N).astype(jnp.int32)
    b_rel_2d = jnp.asarray(b_rel, jnp.float32).reshape(1, 1)

    vmem = pl.BlockSpec(memory_space=pltpu.MemorySpace.VMEM)
    smem = pl.BlockSpec(memory_space=pltpu.MemorySpace.SMEM)

    return pl.pallas_call(
        _global_attention_pool_kernel,
        out_shape=jax.ShapeDtypeStruct((num_graphs, D), jnp.float32),
        in_specs=[vmem, vmem, vmem, vmem, vmem, vmem, vmem, smem],
        out_specs=vmem,
        compiler_params=pltpu.CompilerParams(
            vmem_limit_bytes=32 * 1024 * 1024),
    )(x, src_col, dst_row, batch_col, batch_row,
      w_rel.astype(jnp.float32), w_root.astype(jnp.float32), b_rel_2d)


def _reference(x, edge_index, batch, w_rel, b_rel, w_root, num_graphs):
    """Pure-JAX (f32) reference mirroring the PyG semantics."""
    N = x.shape[0]
    src, dst = edge_index[0], edge_index[1]
    agg = jax.ops.segment_sum(x[src], dst, num_segments=N)          # neighbor sum
    score = (agg @ w_rel + x @ w_root + b_rel).reshape(-1)          # GraphConv(D, 1)
    gmax = jax.ops.segment_max(score, batch, num_segments=num_graphs)
    e = jnp.exp(score - gmax[batch])
    z = jax.ops.segment_sum(e, batch, num_segments=num_graphs)
    soft = e / z[batch]                                             # segment softmax
    att_x = x * soft[:, None]
    return jax.ops.segment_sum(att_x, batch, num_segments=num_graphs)


if __name__ == "__main__":
    # Small shapes: B=2 graphs, 8 nodes each (N=16), D=64 (SAGPooling(64)), E=32 edges.
    B, nodes_per, D, E_per = 2, 8, 64, 16
    N, E = B * nodes_per, B * E_per

    key = jax.random.PRNGKey(0)
    kx, ks, kd, kwr, kwo = jax.random.split(key, 5)

    x = jax.random.normal(kx, (N, D), jnp.float32)

    # edges within each graph (PyG-style batched graphs)
    src_local = jax.random.randint(ks, (B, E_per), 0, nodes_per)
    dst_local = jax.random.randint(kd, (B, E_per), 0, nodes_per)
    offsets = (jnp.arange(B) * nodes_per)[:, None]
    src = (src_local + offsets).reshape(-1).astype(jnp.int32)
    dst = (dst_local + offsets).reshape(-1).astype(jnp.int32)
    edge_index = jnp.stack([src, dst], axis=0)                      # [2, E]
    batch = jnp.repeat(jnp.arange(B, dtype=jnp.int32), nodes_per)   # [N]

    # Deterministic GraphConv(64, 1) parameters (inside SAGPooling).
    w_rel = jax.random.normal(kwr, (D, 1), jnp.float32) * 0.1       # lin_rel weight
    w_root = jax.random.normal(kwo, (D, 1), jnp.float32) * 0.1      # lin_root weight (no bias)
    b_rel = jnp.float32(0.05)                                       # lin_rel bias
    # NOTE: self.conv = GraphConv(hidden_dim, 1) in __init__ is unused in forward().

    out = global_attention_pool(x, edge_index, batch, w_rel, b_rel, w_root, B)
    out = jax.block_until_ready(out)

    ref = _reference(x, edge_index, batch, w_rel, b_rel, w_root, B)
    assert out.shape == (B, D) and out.dtype == jnp.float32
    # Tolerance accounts for the bf16-input pool matmul (f32 accumulate) and the
    # approx EUP reciprocal in the softmax normalizer (~1e-3..1e-2 abs error);
    # real bugs (wrong segment / scatter) produce O(0.1..1) errors.
    assert jnp.allclose(out, ref, atol=2e-2, rtol=2e-2), (out, ref)
    print("KERNEL_OK")
</pallas_src>

<mosaic_0001>
module attributes {stable_mosaic.version = 11 : i64} {
  func.func @_global_attention_pool_kernel(%arg0: memref<16x64xf32, #tpu.memory_space<vmem>>, %arg1: memref<32x1xi32, #tpu.memory_space<vmem>>, %arg2: memref<1x32xi32, #tpu.memory_space<vmem>>, %arg3: memref<16x1xi32, #tpu.memory_space<vmem>>, %arg4: memref<1x16xi32, #tpu.memory_space<vmem>>, %arg5: memref<64x1xf32, #tpu.memory_space<vmem>>, %arg6: memref<64x1xf32, #tpu.memory_space<vmem>>, %arg7: memref<1x1xf32, #tpu.memory_space<smem>>, %arg8: memref<2x64xf32, #tpu.memory_space<vmem>>) attributes {dimension_semantics = [], scalar_prefetch = 0 : i64, scratch_operands = 0 : i64, tpu.core_type = #tpu.core_type<tc>} {
    %c0 = arith.constant 0 : index
    %c0_0 = arith.constant 0 : index
    %0 = vector.load %arg0[%c0, %c0_0] : memref<16x64xf32, #tpu.memory_space<vmem>>, vector<16x64xf32>
    %c0_1 = arith.constant 0 : index
    %c0_2 = arith.constant 0 : index
    %1 = vector.load %arg5[%c0_1, %c0_2] : memref<64x1xf32, #tpu.memory_space<vmem>>, vector<64x1xf32>
    %cst = arith.constant dense<0.000000e+00> : vector<16x1xf32>
    %2 = tpu.matmul %0, %1, %cst {dimension_numbers = #tpu.dot_dimension_numbers<[1], [0], [0], [1], [0, 0, 1, 1], [], []>} : vector<16x64xf32>, vector<64x1xf32>, vector<16x1xf32> -> vector<16x1xf32>
    %c0_3 = arith.constant 0 : index
    %c0_4 = arith.constant 0 : index
    %3 = vector.load %arg6[%c0_3, %c0_4] : memref<64x1xf32, #tpu.memory_space<vmem>>, vector<64x1xf32>
    %cst_5 = arith.constant dense<0.000000e+00> : vector<16x1xf32>
    %4 = tpu.matmul %0, %3, %cst_5 {dimension_numbers = #tpu.dot_dimension_numbers<[1], [0], [0], [1], [0, 0, 1, 1], [], []>} : vector<16x64xf32>, vector<64x1xf32>, vector<16x1xf32> -> vector<16x1xf32>
    %c0_6 = arith.constant 0 : index
    %c0_7 = arith.constant 0 : index
    %5 = vector.load %arg1[%c0_6, %c0_7] : memref<32x1xi32, #tpu.memory_space<vmem>>, vector<32x1xi32>
    %6 = tpu.iota {dimensions = array<i32: 1>} : vector<32x16xi32>
    %7 = vector.broadcast %5 : vector<32x1xi32> to vector<32x16xi32>
    %8 = arith.cmpi eq, %7, %6 : vector<32x16xi32>
    %9 = arith.extui %8 : vector<32x16xi1> to vector<32x16xi32>
    %10 = arith.sitofp %9 : vector<32x16xi32> to vector<32x16xf32>
    %cst_8 = arith.constant dense<0.000000e+00> : vector<32x1xf32>
    %11 = tpu.matmul %10, %2, %cst_8 {dimension_numbers = #tpu.dot_dimension_numbers<[1], [0], [0], [1], [0, 0, 1, 1], [], []>} : vector<32x16xf32>, vector<16x1xf32>, vector<32x1xf32> -> vector<32x1xf32>
    %12 = tpu.iota {dimensions = array<i32: 0>} : vector<16x32xi32>
    %c0_9 = arith.constant 0 : index
    %c0_10 = arith.constant 0 : index
    %13 = vector.load %arg2[%c0_9, %c0_10] : memref<1x32xi32, #tpu.memory_space<vmem>>, vector<1x32xi32>
    %14 = vector.broadcast %13 : vector<1x32xi32> to vector<16x32xi32>
    %15 = arith.cmpi eq, %12, %14 : vector<16x32xi32>
    %16 = arith.extui %15 : vector<16x32xi1> to vector<16x32xi32>
    %17 = arith.sitofp %16 : vector<16x32xi32> to vector<16x32xf32>
    %cst_11 = arith.constant dense<0.000000e+00> : vector<16x1xf32>
    %18 = tpu.matmul %17, %11, %cst_11 {dimension_numbers = #tpu.dot_dimension_numbers<[1], [0], [0], [1], [0, 0, 1, 1], [], []>} : vector<16x32xf32>, vector<32x1xf32>, vector<16x1xf32> -> vector<16x1xf32>
    %19 = arith.addf %18, %4 : vector<16x1xf32>
    %c0_12 = arith.constant 0 : index
    %c0_13 = arith.constant 0 : index
    %20 = memref.load %arg7[%c0_12, %c0_13] : memref<1x1xf32, #tpu.memory_space<smem>>
    %21 = vector.broadcast %20 : f32 to vector<16x1xf32>
    %22 = arith.addf %19, %21 : vector<16x1xf32>
    %c0_14 = arith.constant 0 : index
    %c0_15 = arith.constant 0 : index
    %23 = vector.load %arg3[%c0_14, %c0_15] : memref<16x1xi32, #tpu.memory_space<vmem>>, vector<16x1xi32>
    %24 = tpu.iota {dimensions = array<i32: 1>} : vector<16x2xi32>
    %25 = vector.broadcast %23 : vector<16x1xi32> to vector<16x2xi32>
    %26 = arith.cmpi eq, %25, %24 : vector<16x2xi32>
    %27 = arith.extui %26 : vector<16x2xi1> to vector<16x2xi32>
    %28 = arith.sitofp %27 : vector<16x2xi32> to vector<16x2xf32>
    %cst_16 = arith.constant -1.000000e+30 : f32
    %29 = vector.shape_cast %22 : vector<16x1xf32> to vector<16x1xf32>
    %30 = vector.broadcast %29 : vector<16x1xf32> to vector<16x2xf32>
    %31 = vector.broadcast %cst_16 : f32 to vector<16x2xf32>
    %32 = arith.select %26, %30, %31 : vector<16x2xi1>, vector<16x2xf32>
    %cst_17 = arith.constant dense<0xFF800000> : vector<2xf32>
    %33 = vector.multi_reduction <maximumf>, %32, %cst_17 [0] : vector<16x2xf32> to vector<2xf32>
    %34 = vector.shape_cast %33 : vector<2xf32> to vector<1x2xf32>
    %35 = vector.broadcast %34 : vector<1x2xf32> to vector<16x2xf32>
    %36 = arith.mulf %28, %35 : vector<16x2xf32>
    %cst_18 = arith.constant dense<0.000000e+00> : vector<16xf32>
    %37 = vector.multi_reduction <add>, %36, %cst_18 [1] : vector<16x2xf32> to vector<16xf32>
    %38 = vector.shape_cast %37 : vector<16xf32> to vector<16x1xf32>
    %39 = arith.subf %22, %38 : vector<16x1xf32>
    %40 = math.exp %39 : vector<16x1xf32>
    %41 = vector.broadcast %40 : vector<16x1xf32> to vector<16x2xf32>
    %42 = arith.mulf %28, %41 : vector<16x2xf32>
    %cst_19 = arith.constant dense<0.000000e+00> : vector<2xf32>
    %43 = vector.multi_reduction <add>, %42, %cst_19 [0] : vector<16x2xf32> to vector<2xf32>
    %44 = vector.shape_cast %43 : vector<2xf32> to vector<1x2xf32>
    %45 = vector.broadcast %44 : vector<1x2xf32> to vector<16x2xf32>
    %46 = arith.mulf %28, %45 : vector<16x2xf32>
    %cst_20 = arith.constant dense<0.000000e+00> : vector<16xf32>
    %47 = vector.multi_reduction <add>, %46, %cst_20 [1] : vector<16x2xf32> to vector<16xf32>
    %48 = vector.shape_cast %47 : vector<16xf32> to vector<16x1xf32>
    %49 = tpu.reciprocal %48 {approx = true} : vector<16x1xf32> -> vector<16x1xf32>
    %50 = arith.mulf %40, %49 : vector<16x1xf32>
    %51 = vector.broadcast %50 : vector<16x1xf32> to vector<16x64xf32>
    %52 = arith.mulf %0, %51 : vector<16x64xf32>
    %53 = tpu.iota {dimensions = array<i32: 0>} : vector<2x16xi32>
    %c0_21 = arith.constant 0 : index
    %c0_22 = arith.constant 0 : index
    %54 = vector.load %arg4[%c0_21, %c0_22] : memref<1x16xi32, #tpu.memory_space<vmem>>, vector<1x16xi32>
    %55 = vector.broadcast %54 : vector<1x16xi32> to vector<2x16xi32>
    %56 = arith.cmpi eq, %53, %55 : vector<2x16xi32>
    %57 = arith.extui %56 : vector<2x16xi1> to vector<2x16xi32>
    %58 = arith.sitofp %57 : vector<2x16xi32> to vector<2x16xf32>
    %59 = arith.truncf %58 : vector<2x16xf32> to vector<2x16xbf16>
    %60 = arith.truncf %52 : vector<16x64xf32> to vector<16x64xbf16>
    %cst_23 = arith.constant dense<0.000000e+00> : vector<2x64xf32>
    %61 = tpu.matmul %59, %60, %cst_23 {dimension_numbers = #tpu.dot_dimension_numbers<[1], [0], [0], [1], [0, 0, 1, 1], [], []>} : vector<2x16xbf16>, vector<16x64xbf16>, vector<2x64xf32> -> vector<2x64xf32>
    %c0_24 = arith.constant 0 : index
    %c0_25 = arith.constant 0 : index
    %62 = vector.load %arg8[%c0_24, %c0_25] : memref<2x64xf32, #tpu.memory_space<vmem>>, vector<2x64xf32>
    tpu.vector_store %arg8[%c0_24, %c0_25], %61 {strides = array<i32>} : memref<2x64xf32, #tpu.memory_space<vmem>>, vector<2x64xf32>,
    return
  }
}

</mosaic_0001>

<bundles_post_ra>
// kernel: tpu_custom_call.1
= control target key start
LH: loop header
LB: loop body
LE: loop exit
PB: predicated region body
PF: predicated region fallthrough
CT: control target
= control target key end

     0   :  { %vm42_vm0 = vcmask 523264   ;;  %v804_v5 = vmov 0   ;;  %s1003_s0 = inlined_call_operand.vmem [shape: f32[16,64], index: 0, kind: input, shape index: {}]   ;;  %s1004_s1 = inlined_call_operand.vmem [shape: s32[32,1], index: 1, kind: input, shape index: {}]   ;;  %s1005_s2 = inlined_call_operand.vmem [shape: s32[1,32], index: 2, kind: input, shape index: {}]   ;;  %s1006_s3 = inlined_call_operand.vmem [shape: s32[16,1], index: 3, kind: input, shape index: {}]   ;;  %s1007_s4 = inlined_call_operand.vmem [shape: s32[1,16], index: 4, kind: input, shape index: {}]   ;;  %s1008_s5 = inlined_call_operand.vmem [shape: f32[64,1], index: 5, kind: input, shape index: {}]   ;;  %s1009_s6 = inlined_call_operand.vmem [shape: f32[64,1], index: 6, kind: input, shape index: {}]   ;;  %s1010_s7 = inlined_call_operand.<no memory space> [shape: f32[1,1], index: 7, kind: input, shape index: {}]   ;;  %s1011_s8 = inlined_call_operand.hbm [shape: f32[2,64], index: 8, kind: output, shape index: {}]  }
   0x1   :  { %v34_v0 = vld [vmem:[%s1008_s5] sm:$0xff]  ;;  %v35_v1 = vld [vmem:[%s1008_s5 + $0x8] sm:$0xff]  ;;  %v36_v2 = vld [vmem:[%s1008_s5 + $0x10] sm:$0xff]  ;;  %770 = vset.pattern.permute.xlu0 %v804_v5  ;;  %771 = vset.pattern.permute.xlu1 %v804_v5 }
   0x2   :  { %v720_v3 = vpack.c.bf16 %v35_v1, %v34_v0  ;;  %v37_v4 = vld [vmem:[%s1008_s5 + $0x18] sm:$0xff]  ;;  %v38_v7 = vld [vmem:[%s1008_s5 + $0x20] sm:$0xff]  ;;  %v39_v8 = vld [vmem:[%s1008_s5 + $0x28] sm:$0xff] }
   0x3   :  { %v724_v6 = vpack.c.bf16 %v37_v4, %v36_v2  ;;  %v874_v9 = vld [vmem:[%s1003_s0] sm:$0xff]  ;;  %v209_v11 = vld [vmem:[%s1004_s1 + $0x10] sm:$0xff]  ;;  %v728_v12 = vpack.c.bf16 %v39_v8, %v38_v7  ;;  %v208_v13 = vld [vmem:[%s1004_s1 + $0x8] sm:$0xff] }
   0x4   :  { %721 = vmatprep.subr.bf16.mxu0 %v720_v3  ;;  %671 = vmatprep.mubr.msk.f32.mxu0 %vm42_vm0, %v874_v9  ;;  %v207_v10 = vld [vmem:[%s1004_s1] sm:$0xff]  ;;  %v125_v15 = vld [vmem:[%s1009_s6 + $0x8] sm:$0xff]  ;;  %v40_v16 = vld [vmem:[%s1008_s5 + $0x30] sm:$0xff] }
   0x5   :  { %723 = vmatpush3.bf16.msra.mxu0 %v720_v3  ;;  %214 = vperm.xlu0 %770, %v207_v10   ;;  %v124_v14 = vld [vmem:[%s1009_s6] sm:$0xff]  ;;  %v41_v17 = vld [vmem:[%s1008_s5 + $0x38] sm:$0xff]  ;;  %v126_v20 = vld [vmem:[%s1009_s6 + $0x10] sm:$0xff] }
   0x6   :  { %725 = vmatprep.subr.bf16.mxu0 %v724_v6  ;;  %220 = vperm.xlu1 %771, %v209_v11   ;;  %v210_v18 = vld [vmem:[%s1004_s1 + $0x18] sm:$0xff]  ;;  %v736_v19 = vpack.c.bf16 %v125_v15, %v124_v14 }
   0x7   :  { %690 = vmatprep.mubr.msk.f32.mxu1 %vm42_vm0, %v874_v9  ;;  %v127_v21 = vld [vmem:[%s1009_s6 + $0x18] sm:$0xff] }
   0x8   :  { %14 = vsyncpa [#allocation4], 0  ;;  %v732_v22 = vpack.c.bf16 %v41_v17, %v40_v16  ;;  %v435_v23 = vld [vmem:[%s1006_s3] sm:$0xff]  ;;  %v129_v25 = vld [vmem:[%s1009_s6 + $0x28] sm:$0xff]  ;;  %737 = vmatprep.subr.bf16.mxu1 %v736_v19  ;;  %v740_v27 = vpack.c.bf16 %v127_v21, %v126_v20  ;;  %v805_v33 = vmov 0.0   ;;  %v211_v34 = vlaneseq  ;;  %s807_s30 = smov [#allocation3]  }
   0x9   :  { %727 = vmatpush3.bf16.msra.mxu0 %v724_v6  ;;  %217 = vperm.xlu0 %770, %v208_v13   ;;  %v128_v24 = vld [vmem:[%s1009_s6 + $0x20] sm:$0xff]  ;;  %v436_v26 = vld [vmem:[%s1006_s3 + $0x8] sm:$0xff]  ;;  %v130_v29 = vld [vmem:[%s1009_s6 + $0x30] sm:$0xff]  ;;  %vm237_vm1 = vcmask 130048   ;;  %vm349_vm7 = vcmask 261120   ;;  %v432_v58 = vstv %s1010_s7  ;;  %vm461_vm9 = vcmask 15360  }
   0xa   :  { %729 = vmatprep.subr.bf16.mxu0 %v728_v12  ;;  %223 = vperm.xlu1 %771, %v210_v18   ;;  %v744_v28 = vpack.c.bf16 %v129_v25, %v128_v24  ;;  %v131_v30 = vld [vmem:[%s1009_s6 + $0x38] sm:$0xff]  ;;  %v931_v31 = vld [vmem:[%s1003_s0 + $0x8] sm:$0xff]  ;;  %v938_v35 = vand.u32 127, %v211_v34  ;;  %v952_v47 = vshrl.u32 %v211_v34, 7  ;;  %v611_v48 = vld [vmem:[%s1005_s2] ss:$0 sm:$0xff] }
   0xb   :  { %739 = vmatpush3.bf16.msra.mxu1 %v736_v19  ;;  %v748_v32 = vpack.c.bf16 %v131_v30, %v130_v29  ;;  %vm806_vm12 = vmmov 0   ;;  %s591_s9 = sshll.u32 %s807_s30, 4  ;;  %vm583_vm14 = vcmask 517120   ;;  %s592_s9 = int_to_ptr.vmem [resolvable:$true] %s591_s9 }
   0xc   :  { %741 = vmatprep.subr.bf16.mxu1 %v740_v27  ;;  %vm343_vm6 = vcmp.eq.s32.totalorder %v952_v47, %v611_v48  ;;  %v337_v53 = vadd.s32 8, %v952_v47  ;;  %p785_p1 = scmp.lt.s32.totalorder %s592_s9, %s592_s9 }
   0xd   :  { %731 = vmatpush3.bf16.msra.mxu0 %v728_v12  ;;  %438 = vperm.xlu0 %770, %v435_v23   ;;  %v612_v49 = vsel %vm343_vm6, 1.0, %v805_v33 }
   0xe   :  { %733 = vmatprep.subr.bf16.mxu0 %v732_v22  ;;  %441 = vperm.xlu1 %771, %v436_v26   ;;  %vm344_vm8 = vcmp.eq.s32.totalorder %v337_v53, %v611_v48 }
   0xf   :  { %743 = vmatpush3.bf16.msra.mxu1 %v740_v27  ;;  %v613_v57 = vsel %vm344_vm8, 1.0, %v805_v33 }
  0x10   :  { %745 = vmatprep.subr.bf16.mxu1 %v744_v28 }
  0x11   :  { %735 = vmatpush3.bf16.msra.mxu0 %v732_v22 }
  0x12   :  { %714 = vmatprep.subr.bf16.mxu0 %v805_v33 }
  0x13   :  { %747 = vmatpush3.bf16.msra.mxu1 %v744_v28 }
  0x14   :  { %672 = vmatmul.mubr.msk.f32.vlgmr.msra.gmra.mrb[0].mxu0 %vm42_vm0, %v931_v31  ;;  %749 = vmatprep.subr.bf16.mxu1 %v748_v32 }
  0x15   :  { %716 = vmatprep.mubr.msk.bf16.mxu0 %vm806_vm12, %v805_v33 }
  0x17   :  { %751 = vmatpush3.bf16.msra.mxu1 %v748_v32 }
  0x1a   :  { %691 = vmatmul.mubr.msk.f32.vlgmr.msra.gmra.mrb[0].mxu1 %vm42_vm0, %v931_v31 }
  0x84   :  { %v215_v36 = vpop.permute.xlu0 %214 }
  0x85   :  { %vm225_vm2 = vcmp.eq.s32.totalorder %v215_v36, %v938_v35  ;;  %v221_v39 = vpop.permute.xlu1 %220 }
  0x86   :  { %v603_v37 = vsel %vm225_vm2, 1.0, %v805_v33  ;;  %vm227_vm3 = vcmp.eq.s32.totalorder %v221_v39, %v938_v35 }
  0x87   :  { %697 = vmatprep.mubr.msk.f32.mxu1 %vm237_vm1, %v603_v37  ;;  %v605_v43 = vsel %vm227_vm3, 1.0, %v805_v33 }
  0x88   :  { %v218_v42 = vpop.permute.xlu0 %217 }
  0x89   :  { %vm226_vm4 = vcmp.eq.s32.totalorder %v218_v42, %v938_v35  ;;  %v224_v45 = vpop.permute.xlu1 %223 }
  0x8a   :  { %v604_v44 = vsel %vm226_vm4, 1.0, %v805_v33  ;;  %vm228_vm5 = vcmp.eq.s32.totalorder %v224_v45, %v938_v35 }
  0x8b   :  { %v606_v46 = vsel %vm228_vm5, 1.0, %v805_v33 }
  0x8c   :  { %v439_v0 = vpop.permute.xlu0 %438 }
  0x8d   :  { %v442_v63 = vpop.permute.xlu1 %441  ;;  %vm443_vm11 = vcmp.eq.s32.totalorder %v439_v0, %v938_v35 }
  0x8e   :  { %vm444_vm10 = vcmp.eq.s32.totalorder %v442_v63, %v938_v35  ;;  %v616_v15 = vsel %vm443_vm11, 1.0, %v805_v33 }
  0x8f   :  { %v617_v16 = vsel %vm444_vm10, 1.0, %v805_v33 }
  0xe7   :  { %v673_v38 = vpop.f32.mrb[0].mxu0 }
  0xe8   :  { %v115_v40 = vpop.f32.mrb[1].mxu0 }
  0xe9   :  { %v752_v41 = vpack.c.bf16 %v673_v38, %v115_v40 }
  0xeb   :  { %753 = vmatprep.subr.bf16.mxu1 %v752_v41 }
  0xec   :  { %755 = vmatpush3.bf16.msra.mxu1 %v752_v41 }
  0xef   :  { %698 = vmatmul.mubr.msk.f32.vlgmr.msra.gmra.mrb[2].mxu1 %vm237_vm1, %v604_v44 }
  0xf0   :  { %700 = vmatprep.mubr.msk.f32.mxu1 %vm237_vm1, %v605_v43 }
  0xf3   :  { %701 = vmatmul.mubr.msk.f32.gmra.mrb[4].mxu1 %vm237_vm1, %v606_v46 }
  0xf4   :  { %711 = vmatprep.mubr.msk.f32.mxu1 %vm349_vm7, %v612_v49 }
 0x1c2   :  { %v699_v50 = vpop.f32.mrb[2].mxu1 }
 0x1c3   :  { %v316_v51 = vpop.f32.mrb[3].mxu1 }
 0x1c4   :  { %v756_v52 = vpack.c.bf16 %v699_v50, %v316_v51 }
 0x1c6   :  { %v702_v54 = vpop.f32.mrb[4].mxu1  ;;  %757 = vmatprep.subr.bf16.mxu1 %v756_v52 }
 0x1c7   :  { %v326_v55 = vpop.f32.mrb[5].mxu1  ;;  %759 = vmatpush3.bf16.msra.mxu1 %v756_v52 }
 0x1c8   :  { %v760_v56 = vpack.c.bf16 %v702_v54, %v326_v55  ;;  %v618_v55 = vld [vmem:[%s1007_s4] ss:$0 sm:$0xff]  ;;  %s780_s4 = scalar_lea.vmem %s592_s9, 32 }
 0x1c9   :  { %vm535_vm13 = vcmp.eq.s32.totalorder %v952_v47, %v618_v55  ;;  %p781_p0 = scmp.ne.s32.totalorder %s592_s9, %s780_s4  ;;  %p786_p2 = scmp.lt.s32.totalorder %s780_s4, %s780_s4 }
 0x1ca   :  { %761 = vmatprep.subr.bf16.mxu1 %v760_v56 }
 0x1cb   :  { %763 = vmatpush3.bf16.msra.mxu1 %v760_v56  ;;  %p787_p3 = por %p786_p2, %p785_p1 }
 0x1cd   :  { %p788_p4 = pnand %p787_p3, %p781_p0 }
 0x1ce   :  { %712 = vmatmul.mubr.msk.f32.vlgmr.msra.gmra.mrb[0].mxu1 %vm349_vm7, %v613_v57 }
 0x2a1   :  { %v713_v59 = vpop.f32.mrb[0].mxu1 }
 0x2a2   :  { %v434_v60 = vadd.f32 %v713_v59, %v432_v58  ;;  %v422_v61 = vpop.f32.mrb[1].mxu1 }
 0x2a3   :  { %v433_v62 = vadd.f32 %v432_v58, %v422_v61 }
 0x2a4   :  { %456 = vperm.xlu1 %771, %v434_v60  }
 0x2a5   :  { %451 = vperm.xlu0 %770, %v433_v62  }
 0x323   :  { %v457_v1 = vpop.permute.xlu1 %456 }
 0x324   :  { %v460_v2 = vsel %vm444_vm10, %v457_v1, -1e+30  ;;  %v452_v3 = vpop.permute.xlu0 %451 }
 0x325   :  { %v463_v4 = vsel %vm461_vm9, %v460_v2, -inf  ;;  %v459_v5 = vsel %vm443_vm11, %v452_v3, -1e+30 }
 0x326   :  { %v462_v6 = vsel %vm461_vm9, %v459_v5, -inf }
 0x327   :  { %v464_v7 = vmax.f32 %v462_v6, %v463_v4 }
 0x329   :  { %v465_v8 = vrot.slane %v464_v7, 4 }
 0x32b   :  { %v466_v10 = vmax.f32 %v464_v7, %v465_v8 }
 0x32d   :  { %v467_v11 = vrot.slane %v466_v10, 2 }
 0x32f   :  { %v468_v12 = vmax.f32 %v466_v10, %v467_v11 }
 0x331   :  { %v469_v13 = vrot.slane %v468_v12, 1 }
 0x333   :  { %v470_v14 = vmax.f32 %v468_v12, %v469_v13 }
 0x335   :  { %v472_v17 = vmul.f32 %v617_v16, %v470_v14  ;;  %v471_v18 = vmul.f32 %v616_v15, %v470_v14 }
 0x337   :  { %v476_v19 = vsel %vm461_vm9, %v472_v17, 0.0  ;;  %v473_v20 = vsel %vm461_vm9, %v471_v18, 0.0 }
 0x338   :  { %477 = vadd.xlane.f32.xlu1 %v476_v19  ;;  %474 = vadd.xlane.f32.xlu0 %v473_v20 }
 0x3c5   :  { %v478_v21 = vpop.xlane.xlu1 %477  ;;  %v475_v22 = vpop.xlane.xlu0 %474 }
 0x3c6   :  { %v480_v23 = vsub.f32 %v434_v60, %v478_v21  ;;  %v479_v24 = vsub.f32 %v433_v62, %v475_v22  ;;  %v619_v60 = vsel %vm535_vm13, 1.0, %v805_v33 }
 0x3c7   :  { %v538_v62 = vpack.c.bf16 %v619_v60, %v619_v60 }
 0x3c8   :  { %v483_v25 = vmul.f32 1.442695, %v480_v23  ;;  %v481_v26 = vmul.f32 1.442695, %v479_v24 }
 0x3ca   :  { %772 = vpow2.f32 %v483_v25 }
 0x3cb   :  { %774 = vpow2.f32 %v481_v26 }
 0x3d4   :  { %v773_v27 = vpop.eup %772 }
 0x3d5   :  { %v775_v28 = vpop.eup %774  ;;  %492 = vperm.xlu1 %771, %v773_v27  }
 0x3d6   :  { %487 = vperm.xlu0 %770, %v775_v28  }
 0x454   :  { %v493_v29 = vpop.permute.xlu1 %492 }
 0x455   :  { %v496_v30 = vmul.f32 %v617_v16, %v493_v29  ;;  %v488_v32 = vpop.permute.xlu0 %487 }
 0x456   :  { %v495_v34 = vmul.f32 %v616_v15, %v488_v32 }
 0x457   :  { %v498_v35 = vsel %vm461_vm9, %v496_v30, 0.0 }
 0x458   :  { %v497_v36 = vsel %vm461_vm9, %v495_v34, 0.0 }
 0x459   :  { %v499_v37 = vadd.f32 %v498_v35, %v497_v36 }
 0x45b   :  { %v500_v38 = vrot.slane %v499_v37, 4 }
 0x45d   :  { %v501_v39 = vadd.f32 %v500_v38, %v499_v37 }
 0x45f   :  { %v502_v40 = vrot.slane %v501_v39, 2 }
 0x461   :  { %v503_v41 = vadd.f32 %v502_v40, %v501_v39 }
 0x463   :  { %v504_v42 = vrot.slane %v503_v41, 1 }
 0x465   :  { %v505_v43 = vadd.f32 %v504_v42, %v503_v41 }
 0x467   :  { %v507_v44 = vmul.f32 %v617_v16, %v505_v43  ;;  %v506_v45 = vmul.f32 %v616_v15, %v505_v43 }
 0x469   :  { %v511_v46 = vsel %vm461_vm9, %v507_v44, 0.0  ;;  %v508_v48 = vsel %vm461_vm9, %v506_v45, 0.0 }
 0x46a   :  { %512 = vadd.xlane.f32.xlu1 %v511_v46  ;;  %509 = vadd.xlane.f32.xlu0 %v508_v48 }
 0x4f7   :  { %v513_v49 = vpop.xlane.xlu1 %512  ;;  %v510_v50 = vpop.xlane.xlu0 %509 }
 0x4f8   :  { %776 = vrcp.f32 %v513_v49 }
 0x4f9   :  { %778 = vrcp.f32 %v510_v50 }
 0x502   :  { %v777_v51 = vpop.eup %776 }
 0x503   :  { %v779_v52 = vpop.eup %778  ;;  %v517_v53 = vmul.f32 %v777_v51, %v773_v27 }
 0x504   :  { %v516_v54 = vmul.f32 %v779_v52, %v775_v28 }
 0x505   :  { %525 = vperm.xlu1 %771, %v517_v53  }
 0x506   :  { %520 = vperm.xlu0 %770, %v516_v54  }
 0x584   :  { %v526_v56 = vpop.permute.xlu1 %525 }
 0x585   :  { %v529_v57 = vmul.f32 %v526_v56, %v931_v31  ;;  %v521_v58 = vpop.permute.xlu0 %520 }
 0x586   :  { %v528_v59 = vmul.f32 %v521_v58, %v874_v9 }
 0x588   :  { %v539_v61 = vpack.c.bf16 %v529_v57, %v528_v59 }
 0x58a   :  { %715 = vmatpush3.bf16.msra.mxu0 %v539_v61 }
 0x58d   :  { %717 = vmatmul.mubr.msk.bf16.vlgmr.msra.gmra.mrb[4].mxu0 %vm237_vm1, %v538_v62 }
 0x660   :  { %v577_v63 = vpop.f32.mrb[4].mxu0 }
 0x661   :  { %584 = vst.msk [vmem:[#allocation3] sm:$0x3] %vm583_vm14, %v577_v63  ;;  %v718_v47 = vpop.f32.mrb[5].mxu0 }
 0x662   :  { %v580_v0 = vpop.f32.mrb[6].mxu0 }
 0x663   :  { %791 = shalt.err (!%p788_p4)
}
 0x664   :  { %s792_s12 = scalar_lea.hbm %s1011_s8, 32 }
 0x665   :  { %p793_p5 = scmp.ne.s32.totalorder %s1011_s8, %s792_s12  ;;  %p796_p6 = scmp.lt.u32.totalorder %s792_s12, %s1011_s8 }
 0x667   :  { %p798_p7 = pnand %p796_p6, %p793_p5 }
 0x669   :  { %801 = shalt.err (!%p798_p7)
}
 0x66a   :  { %594 = dma.vmem_to_hbm [thread:$0]  %s592_s9, 32, %s1011_s8, [#allocation4]   ;;  %v719_v9 = vpop.f32.mrb[7].mxu0 }
 0x66b   :  { %802 = dma.done.wait [#allocation4], 32  }
 0x66c   :  { %803 = vsyncadd [#allocation4], 4294967264 }
 0x66d   :  { %598 = vsyncpa [#allocation4], 1 }

</bundles_post_ra>
